<compile_context>
chip_gen: v7x
topology: tpu7x:2x2x1
jax: 0.10.0
libtpu: 0.0.40
codegen_flags: <defaults>
</compile_context>

<pallas_src>
import jax
import jax.numpy as jnp
from jax.experimental import pallas as pl
from jax.experimental.pallas import tpu as pltpu


def _round_up(n: int, m: int) -> int:
    return (n + m - 1) // m * m


def _reparam_kernel(x_ref, w_ref, b_ref, eps_ref, o_ref):
    """One batch tile: fused [mu | logvar] matmul + bias + exp + eps*std + mu."""
    # Single concatenated matmul: (tm, I) @ (I, 2*O) -> (tm, 2*O), f32 accumulation.
    y = jnp.dot(x_ref[...], w_ref[...], preferred_element_type=jnp.float32)
    y = y + b_ref[...]                       # bias broadcast over rows
    o = o_ref.shape[-1]                      # padded latent width (multiple of 128)
    mu = y[:, :o]
    logvar = y[:, o:]
    std = jnp.exp(0.5 * logvar)              # EUP transcendental
    o_ref[...] = (eps_ref[...] * std + mu).astype(o_ref.dtype)


def reparameterize_forward(x, wm, bm, wv, bv, eps, *, block_b=256,
                           compute_dtype=jnp.float32):
    """Fused VAE latent heads + reparameterization.

    x:   (B, I) f32  encoder features
    wm:  (I, O) f32  mu-head weight, stored pre-transposed (PyTorch weight.T)
    bm:  (O,)   f32
    wv:  (I, O) f32  logvar-head weight, pre-transposed
    bv:  (O,)   f32
    eps: (B, O) f32  standard-normal noise
    returns z = eps * exp(0.5 * (x@wv + bv)) + (x@wm + bm), shape (B, O), f32.
    """
    B, I = x.shape
    O = wm.shape[1]
    assert wm.shape == (I, O) and wv.shape == (I, O)
    assert bm.shape == (O,) and bv.shape == (O,) and eps.shape == (B, O)

    # Lane-dense padding: K and N to multiples of 128; batch tile to a multiple of 8.
    i_pad = _round_up(I, 128)
    o_pad = _round_up(O, 128)
    tm = min(block_b, _round_up(B, 8))       # multiple of 8, <= block_b
    b_pad = _round_up(B, tm)

    # Fuse both heads into a single (I_pad, 2*O_pad) weight / (1, 2*O_pad) bias.
    w = jnp.zeros((i_pad, 2 * o_pad), compute_dtype)
    w = w.at[:I, :O].set(wm.astype(compute_dtype))
    w = w.at[:I, o_pad:o_pad + O].set(wv.astype(compute_dtype))
    b = jnp.zeros((1, 2 * o_pad), jnp.float32)
    b = b.at[0, :O].set(bm)
    b = b.at[0, o_pad:o_pad + O].set(bv)

    x_p = jnp.zeros((b_pad, i_pad), compute_dtype).at[:B, :I].set(
        x.astype(compute_dtype))
    eps_p = jnp.zeros((b_pad, o_pad), jnp.float32).at[:B, :O].set(eps)

    # Rough VMEM footprint: double-buffered activations + resident fused weight/bias.
    itemsize = jnp.dtype(compute_dtype).itemsize
    est_bytes = (2 * (w.size * itemsize + b.size * 4)
                 + 2 * (tm * i_pad * itemsize + tm * o_pad * 4 + tm * 2 * o_pad * 4))
    assert est_bytes < 12 * 1024 * 1024, (
        "fused weights too large to keep VMEM-resident")
    # TODO(synk): for very large I*O, add a slow-varying O grid axis (tiled weights)
    # instead of keeping the whole fused weight resident.

    grid = (b_pad // tm,)
    cost = pl.CostEstimate(
        flops=2 * b_pad * i_pad * (2 * o_pad) + 3 * b_pad * o_pad,
        transcendentals=b_pad * o_pad,
        bytes_accessed=(x_p.size * itemsize + w.size * itemsize + b.size * 4
                        + eps_p.size * 4 + b_pad * o_pad * 4),
    )

    out = pl.pallas_call(
        _reparam_kernel,
        out_shape=jax.ShapeDtypeStruct((b_pad, o_pad), jnp.float32),
        grid_spec=pl.GridSpec(
            grid=grid,
            in_specs=[
                pl.BlockSpec((tm, i_pad), lambda i: (i, 0)),          # x batch tile
                pl.BlockSpec((i_pad, 2 * o_pad), lambda i: (0, 0)),   # fused W (resident)
                pl.BlockSpec((1, 2 * o_pad), lambda i: (0, 0)),       # fused bias (resident)
                pl.BlockSpec((tm, o_pad), lambda i: (i, 0)),          # eps batch tile
            ],
            out_specs=pl.BlockSpec((tm, o_pad), lambda i: (i, 0)),
        ),
        compiler_params=pltpu.CompilerParams(
            dimension_semantics=("parallel",)),
        cost_estimate=cost,
    )(x_p, w, b, eps_p)

    return out[:B, :O]


if __name__ == "__main__":
    # Small shapes consistent with the module: encoder features I -> rep_size O=500.
    B, I, O = 16, 200, 500

    key = jax.random.PRNGKey(0)
    kx, kwm, kbm, kwv, kbv, keps = jax.random.split(key, 6)

    bound = 1.0 / (I ** 0.5)
    x = jax.random.normal(kx, (B, I), dtype=jnp.float32)
    wm = jax.random.uniform(kwm, (I, O), jnp.float32, -bound, bound)
    bm = jax.random.uniform(kbm, (O,), jnp.float32, -bound, bound)
    wv = jax.random.uniform(kwv, (I, O), jnp.float32, -bound, bound)
    bv = jax.random.uniform(kbv, (O,), jnp.float32, -bound, bound)
    eps = jax.random.normal(keps, (B, O), dtype=jnp.float32)

    z = reparameterize_forward(x, wm, bm, wv, bv, eps)
    z = jax.block_until_ready(z)

    # Reference in plain JAX (f32, highest matmul precision).
    mu_ref = jnp.dot(x, wm, precision=jax.lax.Precision.HIGHEST) + bm
    logv_ref = jnp.dot(x, wv, precision=jax.lax.Precision.HIGHEST) + bv
    ref = eps * jnp.exp(0.5 * logv_ref) + mu_ref

    assert z.shape == (B, O)
    err = float(jnp.max(jnp.abs(z - ref)))
    assert jnp.allclose(z, ref, atol=1e-4, rtol=1e-4), f"mismatch vs reference: {err}"

    print("KERNEL_OK")
</pallas_src>

<mosaic_0001>
module attributes {stable_mosaic.version = 11 : i64} {
  func.func @_reparam_kernel(%arg0: i32, %arg1: memref<16x256xf32, #tpu.memory_space<vmem>>, %arg2: memref<256x1024xf32, #tpu.memory_space<vmem>>, %arg3: memref<1x1024xf32, #tpu.memory_space<vmem>>, %arg4: memref<16x512xf32, #tpu.memory_space<vmem>>, %arg5: memref<16x512xf32, #tpu.memory_space<vmem>>) attributes {dimension_semantics = [#tpu.dimension_semantics<parallel>], iteration_bounds = array<i64: 1>, scalar_prefetch = 0 : i64, scratch_operands = 0 : i64, tpu.core_type = #tpu.core_type<tc>, window_params = [{transform_indices = @transform_0, window_bounds = array<i64: 16, 256>}, {pipeline_mode = #tpu.pipeline_mode<synchronous>, transform_indices = @transform_1, window_bounds = array<i64: 256, 1024>}, {pipeline_mode = #tpu.pipeline_mode<synchronous>, transform_indices = @transform_2, window_bounds = array<i64: 1, 1024>}, {transform_indices = @transform_3, window_bounds = array<i64: 16, 512>}, {transform_indices = @transform_4, window_bounds = array<i64: 16, 512>}]} {
    %c0 = arith.constant 0 : index
    %c0_0 = arith.constant 0 : index
    %0 = vector.load %arg1[%c0, %c0_0] : memref<16x256xf32, #tpu.memory_space<vmem>>, vector<16x256xf32>
    %c0_1 = arith.constant 0 : index
    %c0_2 = arith.constant 0 : index
    %1 = vector.load %arg2[%c0_1, %c0_2] : memref<256x1024xf32, #tpu.memory_space<vmem>>, vector<256x1024xf32>
    %cst = arith.constant dense<0.000000e+00> : vector<16x1024xf32>
    %2 = tpu.matmul %0, %1, %cst {dimension_numbers = #tpu.dot_dimension_numbers<[1], [0], [0], [1], [0, 0, 1, 1], [], []>} : vector<16x256xf32>, vector<256x1024xf32>, vector<16x1024xf32> -> vector<16x1024xf32>
    %c0_3 = arith.constant 0 : index
    %c0_4 = arith.constant 0 : index
    %3 = vector.load %arg3[%c0_3, %c0_4] : memref<1x1024xf32, #tpu.memory_space<vmem>>, vector<1x1024xf32>
    %4 = vector.broadcast %3 : vector<1x1024xf32> to vector<16x1024xf32>
    %5 = arith.addf %2, %4 : vector<16x1024xf32>
    %6 = vector.extract_strided_slice %5 {offsets = [0, 0], sizes = [16, 512], strides = [1, 1]} : vector<16x1024xf32> to vector<16x512xf32>
    %7 = vector.extract_strided_slice %5 {offsets = [0, 512], sizes = [16, 512], strides = [1, 1]} : vector<16x1024xf32> to vector<16x512xf32>
    %cst_5 = arith.constant 5.000000e-01 : f32
    %8 = vector.broadcast %cst_5 : f32 to vector<16x512xf32>
    %9 = arith.mulf %8, %7 : vector<16x512xf32>
    %10 = math.exp %9 : vector<16x512xf32>
    %c0_6 = arith.constant 0 : index
    %c0_7 = arith.constant 0 : index
    %11 = vector.load %arg4[%c0_6, %c0_7] : memref<16x512xf32, #tpu.memory_space<vmem>>, vector<16x512xf32>
    %12 = arith.mulf %11, %10 : vector<16x512xf32>
    %13 = arith.addf %12, %6 : vector<16x512xf32>
    %c0_8 = arith.constant 0 : index
    %c0_9 = arith.constant 0 : index
    %14 = vector.load %arg5[%c0_8, %c0_9] : memref<16x512xf32, #tpu.memory_space<vmem>>, vector<16x512xf32>
    tpu.vector_store %arg5[%c0_8, %c0_9], %13 {strides = array<i32>} : memref<16x512xf32, #tpu.memory_space<vmem>>, vector<16x512xf32>,
    return
  }
  func.func @transform_0(%arg0: i32) -> (i32, i32) {
    %c0_i32 = arith.constant 0 : i32
    %c0_i32_0 = arith.constant 0 : i32
    return %arg0, %c0_i32 : i32, i32
  }
  func.func @transform_1(%arg0: i32) -> (i32, i32) {
    %c0_i32 = arith.constant 0 : i32
    %c0_i32_0 = arith.constant 0 : i32
    %c0_i32_1 = arith.constant 0 : i32
    return %c0_i32, %c0_i32_0 : i32, i32
  }
  func.func @transform_2(%arg0: i32) -> (i32, i32) {
    %c0_i32 = arith.constant 0 : i32
    %c0_i32_0 = arith.constant 0 : i32
    %c0_i32_1 = arith.constant 0 : i32
    return %c0_i32, %c0_i32_0 : i32, i32
  }
  func.func @transform_3(%arg0: i32) -> (i32, i32) {
    %c0_i32 = arith.constant 0 : i32
    %c0_i32_0 = arith.constant 0 : i32
    return %arg0, %c0_i32 : i32, i32
  }
  func.func @transform_4(%arg0: i32) -> (i32, i32) {
    %c0_i32 = arith.constant 0 : i32
    %c0_i32_0 = arith.constant 0 : i32
    return %arg0, %c0_i32 : i32, i32
  }
}

</mosaic_0001>

<bundles_post_ra>
// kernel: tpu_custom_call.1
= control target key start
LH: loop header
LB: loop body
LE: loop exit
PB: predicated region body
PF: predicated region fallthrough
CT: control target
= control target key end

     0   :  { %9 = vsyncpa [#allocation3], 0  ;;  %s1314_s0 = inlined_call_operand.hbm [shape: f32[16,256], index: 0, kind: input, shape index: {}]   ;;  %s1315_s1 = inlined_call_operand.hbm [shape: f32[256,1024], index: 1, kind: input, shape index: {}]   ;;  %s1316_s2 = inlined_call_operand.hbm [shape: f32[1,1024], index: 2, kind: input, shape index: {}]   ;;  %s1317_s3 = inlined_call_operand.hbm [shape: f32[16,512], index: 3, kind: input, shape index: {}]   ;;  %s1318_s4 = inlined_call_operand.hbm [shape: f32[16,512], index: 4, kind: output, shape index: {}]  }
   0x1   :  { %10 = vsyncpa [#allocation6], 0 }
   0x2   :  { %11 = vsyncpa [#allocation9], 0 }
   0x3   :  { %12 = vsyncpa [#allocation4], 0  ;;  %s1157_s15 = smov [#allocation5]   ;;  %s1039_s19 = scalar_lea.hbm %s1315_s1, 32768 }
   0x4   :  { %s30_s16 = sshll.u32 %s1157_s15, 4  ;;  %p1040_p0 = scmp.ne.s32.totalorder %s1315_s1, %s1039_s19  ;;  %s31_s16 = int_to_ptr.vmem [resolvable:$true] %s30_s16 }
   0x5   :  { %p1043_p1 = scmp.lt.u32.totalorder %s1039_s19, %s1315_s1 }
   0x7   :  { %p1045_p2 = pnand %p1043_p1, %p1040_p0 }
   0x9   :  { %1048 = shalt.err (!%p1045_p2)
}
   0xa   :  { %s1049_s24 = scalar_lea.vmem %s31_s16, 32768  ;;  %p1054_p4 = scmp.lt.s32.totalorder %s31_s16, %s31_s16 }
   0xb   :  { %p1050_p3 = scmp.ne.s32.totalorder %s31_s16, %s1049_s24  ;;  %p1055_p5 = scmp.lt.s32.totalorder %s1049_s24, %s1049_s24 }
   0xd   :  { %p1056_p6 = por %p1055_p5, %p1054_p4 }
   0xf   :  { %p1057_p7 = pnand %p1056_p6, %p1050_p3 }
  0x11   :  { %1060 = shalt.err (!%p1057_p7)
}
  0x12   :  { %s1158_s25 = smov 1024   ;;  %s1159_s26 = smov 64  }
  0x13   :  { %36 = dma.hbm_to_vmem [thread:$0]  %s1315_s1, 32768, %s31_s16, [#allocation6], %s1158_s25, %s1158_s25, %s1159_s26  }
  0x14   :  { %s1160_s29 = smov [#allocation2]   ;;  %s1061_s7 = scalar_lea.hbm %s1314_s0, 512 }
  0x15   :  { %s18_s30 = sshll.u32 %s1160_s29, 4  ;;  %p1062_p8 = scmp.ne.s32.totalorder %s1314_s0, %s1061_s7  ;;  %s19_s30 = int_to_ptr.vmem [resolvable:$true] %s18_s30 }
  0x16   :  { %p1065_p9 = scmp.lt.u32.totalorder %s1061_s7, %s1314_s0 }
  0x18   :  { %p1067_p10 = pnand %p1065_p9, %p1062_p8 }
  0x1a   :  { %1070 = shalt.err (!%p1067_p10)
}
  0x1b   :  { %s1071_s12 = scalar_lea.vmem %s19_s30, 512  ;;  %p1076_p12 = scmp.lt.s32.totalorder %s19_s30, %s19_s30 }
  0x1c   :  { %p1072_p11 = scmp.ne.s32.totalorder %s19_s30, %s1071_s12  ;;  %p1077_p13 = scmp.lt.s32.totalorder %s1071_s12, %s1071_s12 }
  0x1e   :  { %p1078_p0 = por %p1077_p13, %p1076_p12 }
  0x20   :  { %p1079_p1 = pnand %p1078_p0, %p1072_p11 }
  0x22   :  { %1082 = shalt.err (!%p1079_p1)
}
  0x23   :  { %s1161_s1 = smov 256   ;;  %s1162_s13 = smov 16  }
  0x24   :  { %24 = dma.hbm_to_vmem [thread:$0]  %s1314_s0, 512, %s19_s30, [#allocation3], %s1161_s1, %s1161_s1, %s1162_s13  }
  0x25   :  { %s1163_s16 = smov [#allocation7]   ;;  %s1164_s18 = smov [#allocation8]  }
  0x26   :  { %s43_s17 = sshll.u32 %s1163_s16, 4  ;;  %s52_s19 = sshll.u32 %s1164_s18, 4  ;;  %s44_s17 = int_to_ptr.vmem [resolvable:$true] %s43_s17  ;;  %s1217_s19 = int_to_ptr.vmem [resolvable:$true] %s52_s19 }
  0x27   :  { %s1083_s22 = scalar_lea.hbm %s1316_s2, 128 }
  0x28   :  { %p1084_p2 = scmp.ne.s32.totalorder %s1316_s2, %s1083_s22  ;;  %p1087_p3 = scmp.lt.u32.totalorder %s1083_s22, %s1316_s2 }
  0x2a   :  { %p1089_p4 = pnand %p1087_p3, %p1084_p2 }
  0x2c   :  { %1092 = shalt.err (!%p1089_p4)
}
  0x2d   :  { %s1093_s0 = scalar_lea.vmem %s44_s17, 128  ;;  %p1098_p6 = scmp.lt.s32.totalorder %s44_s17, %s44_s17 }
  0x2e   :  { %p1094_p5 = scmp.ne.s32.totalorder %s44_s17, %s1093_s0  ;;  %p1099_p7 = scmp.lt.s32.totalorder %s1093_s0, %s1093_s0 }
  0x30   :  { %p1100_p8 = por %p1099_p7, %p1098_p6 }
  0x32   :  { %p1101_p9 = pnand %p1100_p8, %p1094_p5 }
  0x34   :  { %1104 = shalt.err (!%p1101_p9)
}
  0x35   :  { %46 = dma.hbm_to_vmem [thread:$0]  %s1316_s2, 128, %s44_s17, [#allocation6]  }
  0x36   :  { %s1105_s5 = scalar_lea.hbm %s1317_s3, 1024 }
  0x37   :  { %p1106_p10 = scmp.ne.s32.totalorder %s1317_s3, %s1105_s5  ;;  %p1109_p11 = scmp.lt.u32.totalorder %s1105_s5, %s1317_s3 }
  0x39   :  { %p1111_p12 = pnand %p1109_p11, %p1106_p10 }
  0x3b   :  { %1114 = shalt.err (!%p1111_p12)
}
  0x3c   :  { %s1115_s10 = scalar_lea.vmem %s1217_s19, 1024  ;;  %p1120_p0 = scmp.lt.s32.totalorder %s1217_s19, %s1217_s19 }
  0x3d   :  { %p1116_p13 = scmp.ne.s32.totalorder %s1217_s19, %s1115_s10  ;;  %p1121_p1 = scmp.lt.s32.totalorder %s1115_s10, %s1115_s10 }
  0x3f   :  { %p1122_p2 = por %p1121_p1, %p1120_p0 }
  0x41   :  { %p1123_p3 = pnand %p1122_p2, %p1116_p13 }
  0x43   :  { %1126 = shalt.err (!%p1123_p3)
}
  0x44   :  { %s1165_s2 = smov 512   ;;  %s1166_s11 = smov 32  }
  0x45   :  { %58 = dma.hbm_to_vmem [thread:$0]  %s1317_s3, 1024, %s1217_s19, [#allocation9], %s1165_s2, %s1165_s2, %s1166_s11  }
  0x46   :  { %1149 = dma.done.wait [#allocation3], 512  }
  0x47   :  { %1150 = vsyncadd [#allocation3], 4294966784 }
  0x48   :  { %1151 = dma.done.wait [#allocation6], 32896  }
  0x49   :  { %1152 = vsyncadd [#allocation6], 4294934400 }
  0x4a   :  { %1153 = dma.done.wait [#allocation9], 1024  }
  0x4b   :  { %1154 = vsyncadd [#allocation9], 4294966272  ;;  %v76_v0 = vld [vmem:[#allocation5 + $0x8] sm:$0xff]  ;;  %v78_v2 = vld [vmem:[#allocation5 + $0x18] sm:$0xff]  ;;  %s1167_s3 = smov [#allocation10]  }
  0x4c   :  { %v84_v1 = vld [vmem:[#allocation5 + $0x48] sm:$0xff]  ;;  %v86_v4 = vld [vmem:[#allocation5 + $0x58] sm:$0xff]  ;;  %v75_v5 = vld [vmem:[#allocation5] sm:$0xff]  ;;  %s742_s13 = sshll.u32 %s1167_s3, 4  ;;  %s743_s13 = int_to_ptr.vmem [resolvable:$true] %s742_s13 }
  0x4d   :  { %v756_v3 = vpack.c.bf16 %v84_v1, %v76_v0  ;;  %v83_v6 = vld [vmem:[#allocation5 + $0x40] sm:$0xff]  ;;  %v820_v7 = vpack.c.bf16 %v86_v4, %v78_v2  ;;  %v77_v9 = vld [vmem:[#allocation5 + $0x10] sm:$0xff]  ;;  %v92_v11 = vld [vmem:[#allocation5 + $0x88] sm:$0xff]  ;;  %s1127_s14 = scalar_lea.vmem %s743_s13, 1024  ;;  %p1132_p5 = scmp.lt.s32.totalorder %s743_s13, %s743_s13 }
  0x4e   :  { %v758_v8 = vpack.c.bf16 %v83_v6, %v75_v5  ;;  %v85_v10 = vld [vmem:[#allocation5 + $0x50] sm:$0xff]  ;;  %v100_v13 = vld [vmem:[#allocation5 + $0xc8] sm:$0xff]  ;;  %v94_v14 = vld [vmem:[#allocation5 + $0x98] sm:$0xff]  ;;  %p1128_p4 = scmp.ne.s32.totalorder %s743_s13, %s1127_s14  ;;  %p1133_p6 = scmp.lt.s32.totalorder %s1127_s14, %s1127_s14 }
  0x4f   :  { %757 = vmatprep.subr.bf16.mxu0 %v756_v3  ;;  %v822_v12 = vpack.c.bf16 %v85_v10, %v77_v9  ;;  %v102_v15 = vld [vmem:[#allocation5 + $0xd8] sm:$0xff]  ;;  %821 = vmatprep.subr.bf16.mxu1 %v820_v7  ;;  %v760_v16 = vpack.c.bf16 %v100_v13, %v92_v11  ;;  %v91_v18 = vld [vmem:[#allocation5 + $0x80] sm:$0xff]  ;;  %v93_v20 = vld [vmem:[#allocation5 + $0x90] sm:$0xff] }
  0x50   :  { %759 = vmatpush1.bf16.msra.mxu0 %v758_v8  ;;  %v824_v17 = vpack.c.bf16 %v102_v15, %v94_v14  ;;  %v99_v19 = vld [vmem:[#allocation5 + $0xc0] sm:$0xff]  ;;  %v101_v22 = vld [vmem:[#allocation5 + $0xd0] sm:$0xff]  ;;  %v108_v23 = vld [vmem:[#allocation5 + $0x108] sm:$0xff]  ;;  %p1134_p7 = por %p1133_p6, %p1132_p5 }
  0x51   :  { %823 = vmatpush1.bf16.msra.mxu1 %v822_v12  ;;  %v762_v21 = vpack.c.bf16 %v99_v19, %v91_v18  ;;  %v116_v24 = vld [vmem:[#allocation5 + $0x148] sm:$0xff]  ;;  %761 = vmatprep.subr.bf16.mxu0 %v760_v16  ;;  %v826_v25 = vpack.c.bf16 %v101_v22, %v93_v20  ;;  %v110_v27 = vld [vmem:[#allocation5 + $0x118] sm:$0xff]  ;;  %v107_v29 = vld [vmem:[#allocation5 + $0x100] sm:$0xff] }
  0x52   :  { %825 = vmatprep.subr.bf16.mxu1 %v824_v17  ;;  %v764_v26 = vpack.c.bf16 %v116_v24, %v108_v23  ;;  %v118_v28 = vld [vmem:[#allocation5 + $0x158] sm:$0xff]  ;;  %v115_v31 = vld [vmem:[#allocation5 + $0x140] sm:$0xff]  ;;  %v109_v32 = vld [vmem:[#allocation5 + $0x110] sm:$0xff]  ;;  %p1135_p8 = pnand %p1134_p7, %p1128_p4 }
  0x53   :  { %v828_v30 = vpack.c.bf16 %v118_v28, %v110_v27  ;;  %v117_v33 = vld [vmem:[#allocation5 + $0x150] sm:$0xff]  ;;  %v766_v34 = vpack.c.bf16 %v115_v31, %v107_v29  ;;  %v124_v35 = vld [vmem:[#allocation5 + $0x188] sm:$0xff]  ;;  %v126_v37 = vld [vmem:[#allocation5 + $0x198] sm:$0xff] }
  0x54   :  { %763 = vmatpush1.bf16.msra.mxu0 %v762_v21  ;;  %v132_v36 = vld [vmem:[#allocation5 + $0x1c8] sm:$0xff]  ;;  %v830_v38 = vpack.c.bf16 %v117_v33, %v109_v32  ;;  %v134_v40 = vld [vmem:[#allocation5 + $0x1d8] sm:$0xff]  ;;  %v123_v41 = vld [vmem:[#allocation5 + $0x180] sm:$0xff] }
  0x55   :  { %827 = vmatpush1.bf16.msra.mxu1 %v826_v25  ;;  %765 = vmatprep.subr.bf16.mxu0 %v764_v26  ;;  %v768_v39 = vpack.c.bf16 %v132_v36, %v124_v35  ;;  %v131_v42 = vld [vmem:[#allocation5 + $0x1c0] sm:$0xff]  ;;  %v832_v43 = vpack.c.bf16 %v134_v40, %v126_v37  ;;  %v125_v44 = vld [vmem:[#allocation5 + $0x190] sm:$0xff]  ;;  %v140_v46 = vld [vmem:[#allocation5 + $0x208] sm:$0xff] }
  0x56   :  { %829 = vmatprep.subr.bf16.mxu1 %v828_v30  ;;  %v133_v45 = vld [vmem:[#allocation5 + $0x1d0] sm:$0xff]  ;;  %v148_v47 = vld [vmem:[#allocation5 + $0x248] sm:$0xff]  ;;  %v142_v48 = vld [vmem:[#allocation5 + $0x218] sm:$0xff]  ;;  %v770_v50 = vpack.c.bf16 %v131_v42, %v123_v41 }
  0x57   :  { %v150_v49 = vld [vmem:[#allocation5 + $0x258] sm:$0xff]  ;;  %v834_v51 = vpack.c.bf16 %v133_v45, %v125_v44  ;;  %v772_v52 = vpack.c.bf16 %v148_v47, %v140_v46  ;;  %v139_v53 = vld [vmem:[#allocation5 + $0x200] sm:$0xff]  ;;  %v141_v55 = vld [vmem:[#allocation5 + $0x210] sm:$0xff] }
  0x58   :  { %767 = vmatpush1.bf16.msra.mxu0 %v766_v34  ;;  %v147_v54 = vld [vmem:[#allocation5 + $0x240] sm:$0xff]  ;;  %v836_v56 = vpack.c.bf16 %v150_v49, %v142_v48  ;;  %v149_v57 = vld [vmem:[#allocation5 + $0x250] sm:$0xff]  ;;  %v156_v58 = vld [vmem:[#allocation5 + $0x288] sm:$0xff] }
  0x59   :  { %831 = vmatpush1.bf16.msra.mxu1 %v830_v38  ;;  %769 = vmatprep.subr.bf16.mxu0 %v768_v39  ;;  %v164_v59 = vld [vmem:[#allocation5 + $0x2c8] sm:$0xff]  ;;  %v158_v60 = vld [vmem:[#allocation5 + $0x298] sm:$0xff]  ;;  %v774_v62 = vpack.c.bf16 %v147_v54, %v139_v53  ;;  %v838_v63 = vpack.c.bf16 %v149_v57, %v141_v55  ;;  %v155_v1 = vld [vmem:[#allocation5 + $0x280] sm:$0xff] }
  0x5a   :  { %833 = vmatprep.subr.bf16.mxu1 %v832_v43  ;;  %v166_v61 = vld [vmem:[#allocation5 + $0x2d8] sm:$0xff]  ;;  %v776_v0 = vpack.c.bf16 %v164_v59, %v156_v58  ;;  %v163_v2 = vld [vmem:[#allocation5 + $0x2c0] sm:$0xff]  ;;  %v157_v3 = vld [vmem:[#allocation5 + $0x290] sm:$0xff] }
  0x5b   :  { %v840_v4 = vpack.c.bf16 %v166_v61, %v158_v60  ;;  %v165_v5 = vld [vmem:[#allocation5 + $0x2d0] sm:$0xff]  ;;  %v172_v6 = vld [vmem:[#allocation5 + $0x308] sm:$0xff]  ;;  %v174_v8 = vld [vmem:[#allocation5 + $0x318] sm:$0xff]  ;;  %v778_v10 = vpack.c.bf16 %v163_v2, %v155_v1 }
  0x5c   :  { %771 = vmatpush1.bf16.msra.mxu0 %v770_v50  ;;  %v180_v7 = vld [vmem:[#allocation5 + $0x348] sm:$0xff]  ;;  %v182_v9 = vld [vmem:[#allocation5 + $0x358] sm:$0xff]  ;;  %v842_v11 = vpack.c.bf16 %v165_v5, %v157_v3  ;;  %v171_v13 = vld [vmem:[#allocation5 + $0x300] sm:$0xff] }
  0x5d   :  { %835 = vmatpush1.bf16.msra.mxu1 %v834_v51  ;;  %773 = vmatprep.subr.bf16.mxu0 %v772_v52  ;;  %v780_v12 = vpack.c.bf16 %v180_v7, %v172_v6  ;;  %v179_v14 = vld [vmem:[#allocation5 + $0x340] sm:$0xff]  ;;  %v173_v15 = vld [vmem:[#allocation5 + $0x310] sm:$0xff]  ;;  %v844_v16 = vpack.c.bf16 %v182_v9, %v174_v8  ;;  %v188_v18 = vld [vmem:[#allocation5 + $0x388] sm:$0xff] }
  0x5e   :  { %837 = vmatprep.subr.bf16.mxu1 %v836_v56  ;;  %v181_v17 = vld [vmem:[#allocation5 + $0x350] sm:$0xff]  ;;  %v196_v19 = vld [vmem:[#allocation5 + $0x3c8] sm:$0xff]  ;;  %v190_v20 = vld [vmem:[#allocation5 + $0x398] sm:$0xff]  ;;  %v782_v22 = vpack.c.bf16 %v179_v14, %v171_v13 }
  0x5f   :  { %v198_v21 = vld [vmem:[#allocation5 + $0x3d8] sm:$0xff]  ;;  %v846_v23 = vpack.c.bf16 %v181_v17, %v173_v15  ;;  %v784_v24 = vpack.c.bf16 %v196_v19, %v188_v18  ;;  %v187_v25 = vld [vmem:[#allocation5 + $0x380] sm:$0xff]  ;;  %v189_v27 = vld [vmem:[#allocation5 + $0x390] sm:$0xff] }
  0x60   :  { %775 = vmatpush1.bf16.msra.mxu0 %v774_v62  ;;  %v195_v26 = vld [vmem:[#allocation5 + $0x3c0] sm:$0xff]  ;;  %v848_v28 = vpack.c.bf16 %v198_v21, %v190_v20  ;;  %v197_v29 = vld [vmem:[#allocation5 + $0x3d0] sm:$0xff]  ;;  %v204_v30 = vld [vmem:[#allocation5 + $0x408] sm:$0xff] }
  0x61   :  { %839 = vmatpush1.bf16.msra.mxu1 %v838_v63  ;;  %777 = vmatprep.subr.bf16.mxu0 %v776_v0  ;;  %v212_v31 = vld [vmem:[#allocation5 + $0x448] sm:$0xff]  ;;  %v206_v32 = vld [vmem:[#allocation5 + $0x418] sm:$0xff]  ;;  %v786_v34 = vpack.c.bf16 %v195_v26, %v187_v25  ;;  %v850_v35 = vpack.c.bf16 %v197_v29, %v189_v27  ;;  %v203_v37 = vld [vmem:[#allocation5 + $0x400] sm:$0xff] }
  0x62   :  { %841 = vmatprep.subr.bf16.mxu1 %v840_v4  ;;  %v214_v33 = vld [vmem:[#allocation5 + $0x458] sm:$0xff]  ;;  %v788_v36 = vpack.c.bf16 %v212_v31, %v204_v30  ;;  %v211_v38 = vld [vmem:[#allocation5 + $0x440] sm:$0xff]  ;;  %v205_v39 = vld [vmem:[#allocation5 + $0x410] sm:$0xff] }
  0x63   :  { %v852_v40 = vpack.c.bf16 %v214_v33, %v206_v32  ;;  %v213_v41 = vld [vmem:[#allocation5 + $0x450] sm:$0xff]  ;;  %v220_v42 = vld [vmem:[#allocation5 + $0x488] sm:$0xff]  ;;  %v222_v44 = vld [vmem:[#allocation5 + $0x498] sm:$0xff]  ;;  %v790_v46 = vpack.c.bf16 %v211_v38, %v203_v37 }
  0x64   :  { %779 = vmatpush1.bf16.msra.mxu0 %v778_v10  ;;  %v228_v43 = vld [vmem:[#allocation5 + $0x4c8] sm:$0xff]  ;;  %v230_v45 = vld [vmem:[#allocation5 + $0x4d8] sm:$0xff]  ;;  %v854_v47 = vpack.c.bf16 %v213_v41, %v205_v39  ;;  %v219_v49 = vld [vmem:[#allocation5 + $0x480] sm:$0xff] }
  0x65   :  { %843 = vmatpush1.bf16.msra.mxu1 %v842_v11  ;;  %781 = vmatprep.subr.bf16.mxu0 %v780_v12  ;;  %v792_v48 = vpack.c.bf16 %v228_v43, %v220_v42  ;;  %v227_v50 = vld [vmem:[#allocation5 + $0x4c0] sm:$0xff]  ;;  %v221_v51 = vld [vmem:[#allocation5 + $0x490] sm:$0xff]  ;;  %v856_v52 = vpack.c.bf16 %v230_v45, %v222_v44  ;;  %v236_v54 = vld [vmem:[#allocation5 + $0x508] sm:$0xff] }
  0x66   :  { %845 = vmatprep.subr.bf16.mxu1 %v844_v16  ;;  %v229_v53 = vld [vmem:[#allocation5 + $0x4d0] sm:$0xff]  ;;  %v244_v55 = vld [vmem:[#allocation5 + $0x548] sm:$0xff]  ;;  %v238_v56 = vld [vmem:[#allocation5 + $0x518] sm:$0xff]  ;;  %v794_v58 = vpack.c.bf16 %v227_v50, %v219_v49 }
  0x67   :  { %v246_v57 = vld [vmem:[#allocation5 + $0x558] sm:$0xff]  ;;  %v858_v59 = vpack.c.bf16 %v229_v53, %v221_v51  ;;  %v796_v60 = vpack.c.bf16 %v244_v55, %v236_v54  ;;  %v235_v61 = vld [vmem:[#allocation5 + $0x500] sm:$0xff]  ;;  %v237_v63 = vld [vmem:[#allocation5 + $0x510] sm:$0xff] }
  0x68   :  { %783 = vmatpush1.bf16.msra.mxu0 %v782_v22  ;;  %v243_v62 = vld [vmem:[#allocation5 + $0x540] sm:$0xff]  ;;  %v860_v0 = vpack.c.bf16 %v246_v57, %v238_v56  ;;  %v245_v1 = vld [vmem:[#allocation5 + $0x550] sm:$0xff]  ;;  %v252_v2 = vld [vmem:[#allocation5 + $0x588] sm:$0xff] }
  0x69   :  { %847 = vmatpush1.bf16.msra.mxu1 %v846_v23  ;;  %785 = vmatprep.subr.bf16.mxu0 %v784_v24  ;;  %v260_v3 = vld [vmem:[#allocation5 + $0x5c8] sm:$0xff]  ;;  %v254_v4 = vld [vmem:[#allocation5 + $0x598] sm:$0xff]  ;;  %v798_v6 = vpack.c.bf16 %v243_v62, %v235_v61  ;;  %v251_v7 = vld [vmem:[#allocation5 + $0x580] sm:$0xff]  ;;  %v862_v8 = vpack.c.bf16 %v245_v1, %v237_v63 }
  0x6a   :  { %849 = vmatprep.subr.bf16.mxu1 %v848_v28  ;;  %v262_v5 = vld [vmem:[#allocation5 + $0x5d8] sm:$0xff]  ;;  %v800_v9 = vpack.c.bf16 %v260_v3, %v252_v2  ;;  %v259_v10 = vld [vmem:[#allocation5 + $0x5c0] sm:$0xff]  ;;  %v253_v11 = vld [vmem:[#allocation5 + $0x590] sm:$0xff] }
  0x6b   :  { %v261_v12 = vld [vmem:[#allocation5 + $0x5d0] sm:$0xff]  ;;  %v864_v13 = vpack.c.bf16 %v262_v5, %v254_v4  ;;  %v268_v14 = vld [vmem:[#allocation5 + $0x608] sm:$0xff]  ;;  %v270_v17 = vld [vmem:[#allocation5 + $0x618] sm:$0xff]  ;;  %v802_v19 = vpack.c.bf16 %v259_v10, %v251_v7 }
  0x6c   :  { %787 = vmatpush1.bf16.msra.mxu0 %v786_v34  ;;  %v276_v15 = vld [vmem:[#allocation5 + $0x648] sm:$0xff]  ;;  %v278_v18 = vld [vmem:[#allocation5 + $0x658] sm:$0xff]  ;;  %v866_v20 = vpack.c.bf16 %v261_v12, %v253_v11  ;;  %v267_v22 = vld [vmem:[#allocation5 + $0x600] sm:$0xff] }
  0x6d   :  { %851 = vmatpush1.bf16.msra.mxu1 %v850_v35  ;;  %789 = vmatprep.subr.bf16.mxu0 %v788_v36  ;;  %v1251_v16 = vld [vmem:[#allocation2 + $0x8] sm:$0xff]  ;;  %v804_v21 = vpack.c.bf16 %v276_v15, %v268_v14  ;;  %v275_v23 = vld [vmem:[#allocation5 + $0x640] sm:$0xff]  ;;  %v269_v24 = vld [vmem:[#allocation5 + $0x610] sm:$0xff]  ;;  %v868_v25 = vpack.c.bf16 %v278_v18, %v270_v17 }
  0x6e   :  { %853 = vmatprep.subr.bf16.mxu1 %v852_v40  ;;  %437 = vmatprep.mubr.f32.mxu0 %v1251_v16  ;;  %v277_v26 = vld [vmem:[#allocation5 + $0x650] sm:$0xff]  ;;  %v284_v27 = vld [vmem:[#allocation5 + $0x688] sm:$0xff]  ;;  %v286_v29 = vld [vmem:[#allocation5 + $0x698] sm:$0xff]  ;;  %v806_v31 = vpack.c.bf16 %v275_v23, %v267_v22 }
  0x6f   :  { %514 = vmatprep.mubr.f32.mxu1 %v1251_v16  ;;  %v292_v28 = vld [vmem:[#allocation5 + $0x6c8] sm:$0xff]  ;;  %v294_v30 = vld [vmem:[#allocation5 + $0x6d8] sm:$0xff]  ;;  %v870_v32 = vpack.c.bf16 %v277_v26, %v269_v24  ;;  %v283_v34 = vld [vmem:[#allocation5 + $0x680] sm:$0xff] }
  0x70   :  { %791 = vmatpush1.bf16.msra.mxu0 %v790_v46  ;;  %v808_v33 = vpack.c.bf16 %v292_v28, %v284_v27  ;;  %v291_v35 = vld [vmem:[#allocation5 + $0x6c0] sm:$0xff]  ;;  %v285_v36 = vld [vmem:[#allocation5 + $0x690] sm:$0xff]  ;;  %v872_v37 = vpack.c.bf16 %v294_v30, %v286_v29  ;;  %v300_v39 = vld [vmem:[#allocation5 + $0x708] sm:$0xff] }
  0x71   :  { %855 = vmatpush1.bf16.msra.mxu1 %v854_v47  ;;  %793 = vmatprep.subr.bf16.mxu0 %v792_v48  ;;  %v293_v38 = vld [vmem:[#allocation5 + $0x6d0] sm:$0xff]  ;;  %v308_v40 = vld [vmem:[#allocation5 + $0x748] sm:$0xff]  ;;  %v302_v41 = vld [vmem:[#allocation5 + $0x718] sm:$0xff]  ;;  %v810_v43 = vpack.c.bf16 %v291_v35, %v283_v34 }
  0x72   :  { %857 = vmatprep.subr.bf16.mxu1 %v856_v52  ;;  %v310_v42 = vld [vmem:[#allocation5 + $0x758] sm:$0xff]  ;;  %v874_v44 = vpack.c.bf16 %v293_v38, %v285_v36  ;;  %v812_v45 = vpack.c.bf16 %v308_v40, %v300_v39  ;;  %v299_v46 = vld [vmem:[#allocation5 + $0x700] sm:$0xff]  ;;  %v301_v48 = vld [vmem:[#allocation5 + $0x710] sm:$0xff] }
  0x73   :  { %v307_v47 = vld [vmem:[#allocation5 + $0x740] sm:$0xff]  ;;  %v876_v49 = vpack.c.bf16 %v310_v42, %v302_v41  ;;  %v309_v50 = vld [vmem:[#allocation5 + $0x750] sm:$0xff]  ;;  %v316_v51 = vld [vmem:[#allocation5 + $0x788] sm:$0xff] }
  0x74   :  { %795 = vmatpush1.bf16.msra.mxu0 %v794_v58  ;;  %v324_v52 = vld [vmem:[#allocation5 + $0x7c8] sm:$0xff]  ;;  %v318_v53 = vld [vmem:[#allocation5 + $0x798] sm:$0xff]  ;;  %v814_v55 = vpack.c.bf16 %v307_v47, %v299_v46  ;;  %v878_v56 = vpack.c.bf16 %v309_v50, %v301_v48  ;;  %v315_v58 = vld [vmem:[#allocation5 + $0x780] sm:$0xff] }
  0x75   :  { %859 = vmatpush1.bf16.msra.mxu1 %v858_v59  ;;  %797 = vmatprep.subr.bf16.mxu0 %v796_v60  ;;  %v326_v54 = vld [vmem:[#allocation5 + $0x7d8] sm:$0xff]  ;;  %v816_v57 = vpack.c.bf16 %v324_v52, %v316_v51  ;;  %v323_v59 = vld [vmem:[#allocation5 + $0x7c0] sm:$0xff]  ;;  %v317_v60 = vld [vmem:[#allocation5 + $0x790] sm:$0xff] }
  0x76   :  { %861 = vmatprep.subr.bf16.mxu1 %v860_v0  ;;  %v880_v61 = vpack.c.bf16 %v326_v54, %v318_v53  ;;  %v325_v62 = vld [vmem:[#allocation5 + $0x7d0] sm:$0xff]  ;;  %v80_v63 = vld [vmem:[#allocation5 + $0x28] sm:$0xff]  ;;  %v82_v1 = vld [vmem:[#allocation5 + $0x38] sm:$0xff]  ;;  %v818_v3 = vpack.c.bf16 %v323_v59, %v315_v58 }
  0x77   :  { %v88_v0 = vld [vmem:[#allocation5 + $0x68] sm:$0xff]  ;;  %v90_v2 = vld [vmem:[#allocation5 + $0x78] sm:$0xff]  ;;  %v882_v4 = vpack.c.bf16 %v325_v62, %v317_v60  ;;  %v87_v7 = vld [vmem:[#allocation5 + $0x60] sm:$0xff] }
  0x78   :  { %799 = vmatpush1.bf16.msra.mxu0 %v798_v6  ;;  %v884_v5 = vpack.c.bf16 %v88_v0, %v80_v63  ;;  %v79_v6 = vld [vmem:[#allocation5 + $0x20] sm:$0xff]  ;;  %v89_v10 = vld [vmem:[#allocation5 + $0x70] sm:$0xff]  ;;  %v96_v11 = vld [vmem:[#allocation5 + $0xa8] sm:$0xff] }
  0x79   :  { %863 = vmatpush1.bf16.msra.mxu1 %v862_v8  ;;  %801 = vmatprep.subr.bf16.mxu0 %v800_v9  ;;  %v81_v8 = vld [vmem:[#allocation5 + $0x30] sm:$0xff]  ;;  %v948_v9 = vpack.c.bf16 %v90_v2, %v82_v1  ;;  %v104_v12 = vld [vmem:[#allocation5 + $0xe8] sm:$0xff]  ;;  %v106_v14 = vld [vmem:[#allocation5 + $0xf8] sm:$0xff]  ;;  %v886_v17 = vpack.c.bf16 %v87_v7, %v79_v6 }
  0x7a   :  { %865 = vmatprep.subr.bf16.mxu1 %v864_v13  ;;  %v98_v13 = vld [vmem:[#allocation5 + $0xb8] sm:$0xff]  ;;  %v1255_v15 = vld [vmem:[#allocation2] sm:$0xff]  ;;  %v950_v18 = vpack.c.bf16 %v89_v10, %v81_v8  ;;  %v97_v22 = vld [vmem:[#allocation5 + $0xb0] sm:$0xff] }
  0x7b   :  { %v952_v23 = vpack.c.bf16 %v106_v14, %v98_v13  ;;  %v105_v24 = vld [vmem:[#allocation5 + $0xf0] sm:$0xff]  ;;  %v120_v26 = vld [vmem:[#allocation5 + $0x168] sm:$0xff]  ;;  %v114_v27 = vld [vmem:[#allocation5 + $0x138] sm:$0xff] }
  0x7c   :  { %803 = vmatpush1.bf16.msra.mxu0 %v802_v19  ;;  %v888_v19 = vpack.c.bf16 %v104_v12, %v96_v11  ;;  %v122_v28 = vld [vmem:[#allocation5 + $0x178] sm:$0xff]  ;;  %v954_v30 = vpack.c.bf16 %v105_v24, %v97_v22  ;;  %v113_v34 = vld [vmem:[#allocation5 + $0x130] sm:$0xff]  ;;  %v136_v38 = vld [vmem:[#allocation5 + $0x1e8] sm:$0xff] }
  0x7d   :  { %867 = vmatpush1.bf16.msra.mxu1 %v866_v20  ;;  %805 = vmatprep.subr.bf16.mxu0 %v804_v21  ;;  %v95_v20 = vld [vmem:[#allocation5 + $0xa0] sm:$0xff]  ;;  %v956_v35 = vpack.c.bf16 %v122_v28, %v114_v27  ;;  %v121_v36 = vld [vmem:[#allocation5 + $0x170] sm:$0xff]  ;;  %v130_v39 = vld [vmem:[#allocation5 + $0x1b8] sm:$0xff] }
  0x7e   :  { %869 = vmatprep.subr.bf16.mxu1 %v868_v25  ;;  %v103_v21 = vld [vmem:[#allocation5 + $0xe0] sm:$0xff]  ;;  %v112_v25 = vld [vmem:[#allocation5 + $0x128] sm:$0xff]  ;;  %v138_v40 = vld [vmem:[#allocation5 + $0x1f8] sm:$0xff]  ;;  %v958_v42 = vpack.c.bf16 %v121_v36, %v113_v34 }
  0x7f   :  { %v890_v29 = vpack.c.bf16 %v103_v21, %v95_v20  ;;  %v129_v46 = vld [vmem:[#allocation5 + $0x1b0] sm:$0xff]  ;;  %v960_v47 = vpack.c.bf16 %v138_v40, %v130_v39  ;;  %v152_v50 = vld [vmem:[#allocation5 + $0x268] sm:$0xff]  ;;  %v146_v51 = vld [vmem:[#allocation5 + $0x238] sm:$0xff] }
  0x80   :  { %807 = vmatpush1.bf16.msra.mxu0 %v806_v31  ;;  %v892_v31 = vpack.c.bf16 %v120_v26, %v112_v25  ;;  %v137_v48 = vld [vmem:[#allocation5 + $0x1f0] sm:$0xff]  ;;  %v154_v52 = vld [vmem:[#allocation5 + $0x278] sm:$0xff]  ;;  %v168_v62 = vld [vmem:[#allocation5 + $0x2e8] sm:$0xff] }
  0x81   :  { %871 = vmatpush1.bf16.msra.mxu1 %v870_v32  ;;  %809 = vmatprep.subr.bf16.mxu0 %v808_v33  ;;  %v111_v32 = vld [vmem:[#allocation5 + $0x120] sm:$0xff]  ;;  %v962_v54 = vpack.c.bf16 %v137_v48, %v129_v46  ;;  %v145_v58 = vld [vmem:[#allocation5 + $0x230] sm:$0xff]  ;;  %v964_v59 = vpack.c.bf16 %v154_v52, %v146_v51  ;;  %v162_v63 = vld [vmem:[#allocation5 + $0x2b8] sm:$0xff] }
  0x82   :  { %873 = vmatprep.subr.bf16.mxu1 %v872_v37  ;;  %v119_v33 = vld [vmem:[#allocation5 + $0x160] sm:$0xff]  ;;  %v128_v37 = vld [vmem:[#allocation5 + $0x1a8] sm:$0xff]  ;;  %v153_v60 = vld [vmem:[#allocation5 + $0x270] sm:$0xff] }
  0x83   :  { %v894_v41 = vpack.c.bf16 %v119_v33, %v111_v32  ;;  %v170_v0 = vld [vmem:[#allocation5 + $0x2f8] sm:$0xff]  ;;  %v966_v2 = vpack.c.bf16 %v153_v60, %v145_v58  ;;  %v161_v6 = vld [vmem:[#allocation5 + $0x2b0] sm:$0xff]  ;;  %v184_v10 = vld [vmem:[#allocation5 + $0x368] sm:$0xff] }
  0x84   :  { %811 = vmatpush1.bf16.msra.mxu0 %v810_v43  ;;  %v896_v43 = vpack.c.bf16 %v136_v38, %v128_v37  ;;  %v968_v7 = vpack.c.bf16 %v170_v0, %v162_v63  ;;  %v169_v8 = vld [vmem:[#allocation5 + $0x2f0] sm:$0xff]  ;;  %v178_v11 = vld [vmem:[#allocation5 + $0x338] sm:$0xff]  ;;  %v175_v20 = vld [vmem:[#allocation5 + $0x320] sm:$0xff] }
  0x85   :  { %875 = vmatpush1.bf16.msra.mxu1 %v874_v44  ;;  %813 = vmatprep.subr.bf16.mxu0 %v812_v45  ;;  %v127_v44 = vld [vmem:[#allocation5 + $0x1a0] sm:$0xff]  ;;  %v186_v12 = vld [vmem:[#allocation5 + $0x378] sm:$0xff]  ;;  %v177_v22 = vld [vmem:[#allocation5 + $0x330] sm:$0xff] }
  0x86   :  { %877 = vmatprep.subr.bf16.mxu1 %v876_v49  ;;  %v135_v45 = vld [vmem:[#allocation5 + $0x1e0] sm:$0xff]  ;;  %v144_v49 = vld [vmem:[#allocation5 + $0x228] sm:$0xff]  ;;  %v1259_v13 = vld [vmem:[#allocation2 + $0x18] sm:$0xff] }
  0x87   :  { %v898_v53 = vpack.c.bf16 %v135_v45, %v127_v44  ;;  %v183_v21 = vld [vmem:[#allocation5 + $0x360] sm:$0xff]  ;;  %v185_v24 = vld [vmem:[#allocation5 + $0x370] sm:$0xff]  ;;  %v192_v25 = vld [vmem:[#allocation5 + $0x3a8] sm:$0xff] }
  0x88   :  { %815 = vmatpush1.bf16.msra.mxu0 %v814_v55  ;;  %v900_v55 = vpack.c.bf16 %v152_v50, %v144_v49  ;;  %v200_v26 = vld [vmem:[#allocation5 + $0x3e8] sm:$0xff]  ;;  %v194_v27 = vld [vmem:[#allocation5 + $0x3b8] sm:$0xff]  ;;  %v191_v32 = vld [vmem:[#allocation5 + $0x3a0] sm:$0xff] }
  0x89   :  { %879 = vmatpush1.bf16.msra.mxu1 %v878_v56  ;;  %817 = vmatprep.subr.bf16.mxu0 %v816_v57  ;;  %v143_v56 = vld [vmem:[#allocation5 + $0x220] sm:$0xff]  ;;  %v202_v28 = vld [vmem:[#allocation5 + $0x3f8] sm:$0xff]  ;;  %v193_v34 = vld [vmem:[#allocation5 + $0x3b0] sm:$0xff] }
  0x8a   :  { %881 = vmatprep.subr.bf16.mxu1 %v880_v61  ;;  %v151_v57 = vld [vmem:[#allocation5 + $0x260] sm:$0xff]  ;;  %v160_v61 = vld [vmem:[#allocation5 + $0x2a8] sm:$0xff]  ;;  %v201_v36 = vld [vmem:[#allocation5 + $0x3f0] sm:$0xff] }
  0x8b   :  { %v902_v1 = vpack.c.bf16 %v151_v57, %v143_v56  ;;  %v199_v33 = vld [vmem:[#allocation5 + $0x3e0] sm:$0xff]  ;;  %v208_v37 = vld [vmem:[#allocation5 + $0x428] sm:$0xff]  ;;  %v210_v39 = vld [vmem:[#allocation5 + $0x438] sm:$0xff] }
  0x8c   :  { %819 = vmatpush1.bf16.msra.mxu0 %v818_v3  ;;  %v904_v3 = vpack.c.bf16 %v168_v62, %v160_v61  ;;  %v216_v38 = vld [vmem:[#allocation5 + $0x468] sm:$0xff]  ;;  %v218_v40 = vld [vmem:[#allocation5 + $0x478] sm:$0xff]  ;;  %v207_v44 = vld [vmem:[#allocation5 + $0x420] sm:$0xff] }
  0x8d   :  { %883 = vmatpush1.bf16.msra.mxu1 %v882_v4  ;;  %885 = vmatprep.subr.bf16.mxu0 %v884_v5  ;;  %v159_v4 = vld [vmem:[#allocation5 + $0x2a0] sm:$0xff]  ;;  %v209_v46 = vld [vmem:[#allocation5 + $0x430] sm:$0xff]  ;;  %v224_v49 = vld [vmem:[#allocation5 + $0x4a8] sm:$0xff] }
  0x8e   :  { %949 = vmatprep.subr.bf16.mxu1 %v948_v9  ;;  %v167_v5 = vld [vmem:[#allocation5 + $0x2e0] sm:$0xff]  ;;  %v176_v9 = vld [vmem:[#allocation5 + $0x328] sm:$0xff]  ;;  %v217_v48 = vld [vmem:[#allocation5 + $0x470] sm:$0xff] }
  0x8f   :  { %438 = vmatmul.mubr.f32.vlgmr.msra.gmra.mrb[0].mxu0 %v1255_v15  ;;  %v906_v14 = vpack.c.bf16 %v167_v5, %v159_v4  ;;  %v215_v45 = vld [vmem:[#allocation5 + $0x460] sm:$0xff]  ;;  %v232_v50 = vld [vmem:[#allocation5 + $0x4e8] sm:$0xff]  ;;  %v226_v51 = vld [vmem:[#allocation5 + $0x4b8] sm:$0xff] }
  0x90   :  { %515 = vmatmul.mubr.f32.vlgmr.msra.gmra.mrb[0].mxu1 %v1255_v15  ;;  %887 = vmatpush1.bf16.msra.mxu0 %v886_v17  ;;  %v1262_v17 = vld [vmem:[#allocation2 + $0x10] sm:$0xff]  ;;  %v234_v52 = vld [vmem:[#allocation5 + $0x4f8] sm:$0xff]  ;;  %v231_v56 = vld [vmem:[#allocation5 + $0x4e0] sm:$0xff] }
  0x91   :  { %951 = vmatpush1.bf16.msra.mxu1 %v950_v18  ;;  %889 = vmatprep.subr.bf16.mxu0 %v888_v19  ;;  %v970_v18 = vpack.c.bf16 %v169_v8, %v161_v6  ;;  %v908_v19 = vpack.c.bf16 %v184_v10, %v176_v9  ;;  %v225_v57 = vld [vmem:[#allocation5 + $0x4b0] sm:$0xff]  ;;  %v984_v58 = vpack.c.bf16 %v234_v52, %v226_v51  ;;  %v240_v60 = vld [vmem:[#allocation5 + $0x528] sm:$0xff]  ;;  %v242_v62 = vld [vmem:[#allocation5 + $0x538] sm:$0xff] }
  0x92   :  { %953 = vmatprep.subr.bf16.mxu1 %v952_v23  ;;  %443 = vmatprep.mubr.f32.mxu0 %v1259_v13  ;;  %v972_v23 = vpack.c.bf16 %v186_v12, %v178_v11  ;;  %v248_v61 = vld [vmem:[#allocation5 + $0x568] sm:$0xff]  ;;  %v250_v63 = vld [vmem:[#allocation5 + $0x578] sm:$0xff]  ;;  %v247_v4 = vld [vmem:[#allocation5 + $0x560] sm:$0xff] }
  0x93   :  { %520 = vmatprep.mubr.f32.mxu1 %v1259_v13  ;;  %444 = vmatmul.mubr.f32.gmra.mrb[2].mxu0 %v1262_v17  ;;  %v241_v5 = vld [vmem:[#allocation5 + $0x530] sm:$0xff]  ;;  %v988_v6 = vpack.c.bf16 %v250_v63, %v242_v62  ;;  %v256_v8 = vld [vmem:[#allocation5 + $0x5a8] sm:$0xff]  ;;  %v258_v10 = vld [vmem:[#allocation5 + $0x5b8] sm:$0xff] }
  0x94   :  { %891 = vmatpush1.bf16.msra.mxu0 %v890_v29  ;;  %521 = vmatmul.mubr.f32.gmra.mrb[2].mxu1 %v1262_v17  ;;  %v910_v29 = vpack.c.bf16 %v183_v21, %v175_v20  ;;  %v264_v9 = vld [vmem:[#allocation5 + $0x5e8] sm:$0xff]  ;;  %v266_v11 = vld [vmem:[#allocation5 + $0x5f8] sm:$0xff]  ;;  %v263_v20 = vld [vmem:[#allocation5 + $0x5e0] sm:$0xff] }
  0x95   :  { %955 = vmatpush1.bf16.msra.mxu1 %v954_v30  ;;  %893 = vmatprep.subr.bf16.mxu0 %v892_v31  ;;  %v974_v30 = vpack.c.bf16 %v185_v24, %v177_v22  ;;  %v912_v31 = vpack.c.bf16 %v200_v26, %v192_v25  ;;  %v257_v21 = vld [vmem:[#allocation5 + $0x5b0] sm:$0xff]  ;;  %v992_v22 = vpack.c.bf16 %v266_v11, %v258_v10  ;;  %v272_v24 = vld [vmem:[#allocation5 + $0x628] sm:$0xff]  ;;  %v274_v26 = vld [vmem:[#allocation5 + $0x638] sm:$0xff] }
  0x96   :  { %957 = vmatprep.subr.bf16.mxu1 %v956_v35  ;;  %591 = vmatprep.mubr.f32.mxu0 %v1251_v16  ;;  %v976_v35 = vpack.c.bf16 %v202_v28, %v194_v27  ;;  %v280_v25 = vld [vmem:[#allocation5 + $0x668] sm:$0xff]  ;;  %v282_v27 = vld [vmem:[#allocation5 + $0x678] sm:$0xff] }
  0x97   :  { %668 = vmatprep.mubr.f32.mxu1 %v1251_v16  ;;  %v918_v16 = vpack.c.bf16 %v215_v45, %v207_v44  ;;  %v295_v44 = vld [vmem:[#allocation5 + $0x6e0] sm:$0xff]  ;;  %v289_v45 = vld [vmem:[#allocation5 + $0x6b0] sm:$0xff]  ;;  %v314_v51 = vld [vmem:[#allocation5 + $0x778] sm:$0xff] }
  0x98   :  { %895 = vmatpush1.bf16.msra.mxu0 %v894_v41  ;;  %v914_v41 = vpack.c.bf16 %v199_v33, %v191_v32  ;;  %v279_v32 = vld [vmem:[#allocation5 + $0x660] sm:$0xff]  ;;  %v273_v33 = vld [vmem:[#allocation5 + $0x630] sm:$0xff]  ;;  %v330_v62 = vld [vmem:[#allocation5 + $0x7f8] sm:$0xff] }
  0x99   :  { %959 = vmatpush1.bf16.msra.mxu1 %v958_v42  ;;  %897 = vmatprep.subr.bf16.mxu0 %v896_v43  ;;  %v978_v42 = vpack.c.bf16 %v201_v36, %v193_v34  ;;  %v916_v43 = vpack.c.bf16 %v216_v38, %v208_v37  ;;  %v996_v34 = vpack.c.bf16 %v282_v27, %v274_v26  ;;  %v288_v36 = vld [vmem:[#allocation5 + $0x6a8] sm:$0xff]  ;;  %v290_v38 = vld [vmem:[#allocation5 + $0x6b8] sm:$0xff] }
  0x9a   :  { %961 = vmatprep.subr.bf16.mxu1 %v960_v47  ;;  %v980_v47 = vpack.c.bf16 %v218_v40, %v210_v39  ;;  %v296_v37 = vld [vmem:[#allocation5 + $0x6e8] sm:$0xff]  ;;  %v298_v39 = vld [vmem:[#allocation5 + $0x6f8] sm:$0xff] }
  0x9c   :  { %899 = vmatpush1.bf16.msra.mxu0 %v898_v53  ;;  %v982_v53 = vpack.c.bf16 %v217_v48, %v209_v46  ;;  %v1000_v46 = vpack.c.bf16 %v298_v39, %v290_v38  ;;  %v304_v48 = vld [vmem:[#allocation5 + $0x728] sm:$0xff] }
  0x9d   :  { %963 = vmatpush1.bf16.msra.mxu1 %v962_v54  ;;  %901 = vmatprep.subr.bf16.mxu0 %v900_v55  ;;  %v920_v54 = vpack.c.bf16 %v232_v50, %v224_v49  ;;  %v223_v55 = vld [vmem:[#allocation5 + $0x4a0] sm:$0xff]  ;;  %v312_v49 = vld [vmem:[#allocation5 + $0x768] sm:$0xff]  ;;  %v306_v50 = vld [vmem:[#allocation5 + $0x738] sm:$0xff] }
  0x9e   :  { %965 = vmatprep.subr.bf16.mxu1 %v964_v59  ;;  %v233_v59 = vld [vmem:[#allocation5 + $0x4f0] sm:$0xff]  ;;  %v922_v0 = vpack.c.bf16 %v231_v56, %v223_v55  ;;  %v311_v55 = vld [vmem:[#allocation5 + $0x760] sm:$0xff] }
  0x9f   :  { %v305_v56 = vld [vmem:[#allocation5 + $0x730] sm:$0xff] }
  0xa0   :  { %903 = vmatpush1.bf16.msra.mxu0 %v902_v1  ;;  %v986_v1 = vpack.c.bf16 %v233_v59, %v225_v57  ;;  %v1004_v57 = vpack.c.bf16 %v314_v51, %v306_v50  ;;  %v320_v59 = vld [vmem:[#allocation5 + $0x7a8] sm:$0xff] }
  0xa1   :  { %967 = vmatpush1.bf16.msra.mxu1 %v966_v2  ;;  %905 = vmatprep.subr.bf16.mxu0 %v904_v3  ;;  %v924_v2 = vpack.c.bf16 %v248_v61, %v240_v60  ;;  %v239_v3 = vld [vmem:[#allocation5 + $0x520] sm:$0xff]  ;;  %v328_v60 = vld [vmem:[#allocation5 + $0x7e8] sm:$0xff]  ;;  %v322_v61 = vld [vmem:[#allocation5 + $0x7b8] sm:$0xff] }
  0xa2   :  { %969 = vmatprep.subr.bf16.mxu1 %v968_v7  ;;  %v249_v7 = vld [vmem:[#allocation5 + $0x570] sm:$0xff]  ;;  %v926_v12 = vpack.c.bf16 %v247_v4, %v239_v3  ;;  %v327_v3 = vld [vmem:[#allocation5 + $0x7e0] sm:$0xff]  ;;  %v1008_v4 = vpack.c.bf16 %v330_v62, %v322_v61 }
  0xa4   :  { %907 = vmatpush1.bf16.msra.mxu0 %v906_v14  ;;  %v990_v14 = vpack.c.bf16 %v249_v7, %v241_v5  ;;  %v321_v5 = vld [vmem:[#allocation5 + $0x7b0] sm:$0xff] }
  0xa5   :  { %971 = vmatpush1.bf16.msra.mxu1 %v970_v18  ;;  %909 = vmatprep.subr.bf16.mxu0 %v908_v19  ;;  %v928_v18 = vpack.c.bf16 %v264_v9, %v256_v8  ;;  %v255_v19 = vld [vmem:[#allocation5 + $0x5a0] sm:$0xff] }
  0xa6   :  { %973 = vmatprep.subr.bf16.mxu1 %v972_v23  ;;  %v265_v23 = vld [vmem:[#allocation5 + $0x5f0] sm:$0xff]  ;;  %v930_v28 = vpack.c.bf16 %v263_v20, %v255_v19 }
  0xa8   :  { %911 = vmatpush1.bf16.msra.mxu0 %v910_v29  ;;  %v994_v29 = vpack.c.bf16 %v265_v23, %v257_v21 }
  0xa9   :  { %975 = vmatpush1.bf16.msra.mxu1 %v974_v30  ;;  %913 = vmatprep.subr.bf16.mxu0 %v912_v31  ;;  %v932_v30 = vpack.c.bf16 %v280_v25, %v272_v24  ;;  %v271_v31 = vld [vmem:[#allocation5 + $0x620] sm:$0xff] }
  0xaa   :  { %977 = vmatprep.subr.bf16.mxu1 %v976_v35  ;;  %v281_v35 = vld [vmem:[#allocation5 + $0x670] sm:$0xff]  ;;  %v934_v40 = vpack.c.bf16 %v279_v32, %v271_v31  ;;  %v331_v24 = vld [vmem:[#allocation7] sm:$0xff] }
  0xac   :  { %915 = vmatpush1.bf16.msra.mxu0 %v914_v41  ;;  %v998_v41 = vpack.c.bf16 %v281_v35, %v273_v33 }
  0xad   :  { %979 = vmatpush1.bf16.msra.mxu1 %v978_v42  ;;  %917 = vmatprep.subr.bf16.mxu0 %v916_v43  ;;  %v936_v42 = vpack.c.bf16 %v296_v37, %v288_v36  ;;  %v287_v43 = vld [vmem:[#allocation5 + $0x6a0] sm:$0xff] }
  0xae   :  { %981 = vmatprep.subr.bf16.mxu1 %v980_v47  ;;  %v297_v47 = vld [vmem:[#allocation5 + $0x6f0] sm:$0xff]  ;;  %v938_v52 = vpack.c.bf16 %v295_v44, %v287_v43 }
  0xb0   :  { %919 = vmatpush1.bf16.msra.mxu0 %v918_v16  ;;  %v1002_v16 = vpack.c.bf16 %v297_v47, %v289_v45 }
  0xb1   :  { %983 = vmatpush1.bf16.msra.mxu1 %v982_v53  ;;  %921 = vmatprep.subr.bf16.mxu0 %v920_v54  ;;  %v940_v53 = vpack.c.bf16 %v312_v49, %v304_v48  ;;  %v303_v54 = vld [vmem:[#allocation5 + $0x720] sm:$0xff] }
  0xb2   :  { %985 = vmatprep.subr.bf16.mxu1 %v984_v58  ;;  %v313_v58 = vld [vmem:[#allocation5 + $0x770] sm:$0xff]  ;;  %v942_v63 = vpack.c.bf16 %v311_v55, %v303_v54 }
  0xb4   :  { %923 = vmatpush1.bf16.msra.mxu0 %v922_v0  ;;  %v1006_v0 = vpack.c.bf16 %v313_v58, %v305_v56 }
  0xb5   :  { %987 = vmatpush1.bf16.msra.mxu1 %v986_v1  ;;  %925 = vmatprep.subr.bf16.mxu0 %v924_v2  ;;  %v944_v1 = vpack.c.bf16 %v328_v60, %v320_v59  ;;  %v319_v2 = vld [vmem:[#allocation5 + $0x7a0] sm:$0xff] }
  0xb6   :  { %989 = vmatprep.subr.bf16.mxu1 %v988_v6  ;;  %v329_v6 = vld [vmem:[#allocation5 + $0x7f0] sm:$0xff]  ;;  %v946_v7 = vpack.c.bf16 %v327_v3, %v319_v2  ;;  %v705_v2 = vld [vmem:[#allocation8] sm:$0xff] }
  0xb7   :  { %v1010_v8 = vpack.c.bf16 %v329_v6, %v321_v5 }
  0xb8   :  { %927 = vmatpush1.bf16.msra.mxu0 %v926_v12 }
  0xb9   :  { %991 = vmatpush1.bf16.msra.mxu1 %v990_v14  ;;  %929 = vmatprep.subr.bf16.mxu0 %v928_v18 }
  0xba   :  { %993 = vmatprep.subr.bf16.mxu1 %v992_v22 }
  0xbc   :  { %931 = vmatpush1.bf16.msra.mxu0 %v930_v28 }
  0xbd   :  { %995 = vmatpush1.bf16.msra.mxu1 %v994_v29  ;;  %933 = vmatprep.subr.bf16.mxu0 %v932_v30 }
  0xbe   :  { %997 = vmatprep.subr.bf16.mxu1 %v996_v34 }
  0xc0   :  { %935 = vmatpush1.bf16.msra.mxu0 %v934_v40 }
  0xc1   :  { %999 = vmatpush1.bf16.msra.mxu1 %v998_v41  ;;  %937 = vmatprep.subr.bf16.mxu0 %v936_v42 }
  0xc2   :  { %1001 = vmatprep.subr.bf16.mxu1 %v1000_v46 }
  0xc4   :  { %939 = vmatpush1.bf16.msra.mxu0 %v938_v52 }
  0xc5   :  { %1003 = vmatpush1.bf16.msra.mxu1 %v1002_v16  ;;  %941 = vmatprep.subr.bf16.mxu0 %v940_v53 }
  0xc6   :  { %1005 = vmatprep.subr.bf16.mxu1 %v1004_v57 }
  0xc8   :  { %943 = vmatpush1.bf16.msra.mxu0 %v942_v63 }
  0xc9   :  { %1007 = vmatpush1.bf16.msra.mxu1 %v1006_v0  ;;  %945 = vmatprep.subr.bf16.mxu0 %v944_v1 }
  0xca   :  { %1009 = vmatprep.subr.bf16.mxu1 %v1008_v4  ;;  %v707_v4 = vld [vmem:[#allocation8 + $0x10] sm:$0xff] }
  0xcc   :  { %947 = vmatpush1.bf16.msra.mxu0 %v946_v7  ;;  %v706_v7 = vld [vmem:[#allocation8 + $0x8] sm:$0xff] }
  0xcd   :  { %1011 = vmatpush1.bf16.msra.mxu1 %v1010_v8 }
  0xcf   :  { %592 = vmatmul.mubr.f32.vlgmr.msra.gmra.mrb[4].mxu0 %v1255_v15 }
  0xd0   :  { %669 = vmatmul.mubr.f32.vlgmr.msra.gmra.mrb[4].mxu1 %v1255_v15  ;;  %597 = vmatprep.mubr.f32.mxu0 %v1259_v13 }
  0xd1   :  { %674 = vmatprep.mubr.f32.mxu1 %v1259_v13  ;;  %v333_v13 = vlaneseq }
  0xd3   :  { %598 = vmatmul.mubr.f32.gmra.mrb[6].mxu0 %v1262_v17  ;;  %v334_v20 = vshrl.u32 %v333_v13, 7 }
  0xd4   :  { %675 = vmatmul.mubr.f32.gmra.mrb[6].mxu1 %v1262_v17 }
  0xd5   :  { %v351_v21 = vsub.s32 4, %v334_v20  ;;  %v359_v17 = vsub.s32 6, %v334_v20  ;;  %v355_v22 = vsub.s32 5, %v334_v20  ;;  %v363_v23 = vsub.s32 7, %v334_v20 }
  0xd6   :  { %v335_v57 = vsub.s32 0, %v334_v20  ;;  %v343_v60 = vsub.s32 2, %v334_v20  ;;  %v339_v62 = vsub.s32 1, %v334_v20  ;;  %v347_v63 = vsub.s32 3, %v334_v20  ;;  %v709_v20 = vld [vmem:[#allocation8 + $0x20] sm:$0xff] }
  0xd7   :  { %v352_v25 = vrot.slane %v331_v24, %v351_v21  ;;  %v360_v26 = vrot.slane %v331_v24, %v359_v17  ;;  %v356_v27 = vrot.slane %v331_v24, %v355_v22  ;;  %v364_v28 = vrot.slane %v331_v24, %v363_v23  ;;  %v708_v17 = vld [vmem:[#allocation8 + $0x18] sm:$0xff] }
  0xd8   :  { %v336_v0 = vrot.slane %v331_v24, %v335_v57  ;;  %v344_v1 = vrot.slane %v331_v24, %v343_v60  ;;  %v340_v3 = vrot.slane %v331_v24, %v339_v62  ;;  %v348_v6 = vrot.slane %v331_v24, %v347_v63 }
 0x162   :  { %v1275_v9 = vpop.f32.mrb[0].mxu0 }
 0x163   :  { %v1277_v10 = vpop.f32.mrb[0].mxu1  ;;  %v1279_v11 = vpop.f32.mrb[1].mxu0  ;;  %v440_v13 = vadd.f32 %v1275_v9, %v336_v0 }
 0x164   :  { %v1281_v12 = vpop.f32.mrb[1].mxu1  ;;  %v517_v23 = vadd.f32 %v1277_v10, %v344_v1 }
 0x165   :  { %v519_v24 = vadd.f32 %v1281_v12, %v348_v6 }
 0x166   :  { %v1283_v14 = vpop.f32.mrb[2].mxu0 }
 0x167   :  { %v1285_v18 = vpop.f32.mrb[2].mxu1  ;;  %v1287_v15 = vpop.f32.mrb[3].mxu0 }
 0x168   :  { %v1289_v19 = vpop.f32.mrb[3].mxu1 }
 0x1a2   :  { %v593_v29 = vpop.f32.mrb[4].mxu0 }
 0x1a3   :  { %v594_v30 = vadd.f32 %v593_v29, %v352_v25  ;;  %v670_v31 = vpop.f32.mrb[4].mxu1  ;;  %v595_v32 = vpop.f32.mrb[5].mxu0 }
 0x1a4   :  { %v671_v33 = vadd.f32 %v670_v31, %v360_v26  ;;  %v596_v34 = vadd.f32 %v595_v32, %v356_v27  ;;  %v672_v35 = vpop.f32.mrb[5].mxu1 }
 0x1a5   :  { %v681_v36 = vmul.f32 0.5, %v594_v30  ;;  %v673_v37 = vadd.f32 %v672_v35, %v364_v28  ;;  %v711_v30 = vld [vmem:[#allocation8 + $0x30] sm:$0xff]  ;;  %v446_v35 = vadd.f32 %v1283_v14, %v336_v0  ;;  %v525_v14 = vadd.f32 %v1289_v19, %v348_v6 }
 0x1a6   :  { %v683_v38 = vmul.f32 0.5, %v671_v33  ;;  %v682_v39 = vmul.f32 0.5, %v596_v34  ;;  %v599_v40 = vpop.f32.mrb[6].mxu0  ;;  %v710_v34 = vld [vmem:[#allocation8 + $0x28] sm:$0xff] }
 0x1a7   :  { %v689_v41 = vmul.f32 1.442695, %v681_v36  ;;  %v684_v42 = vmul.f32 0.5, %v673_v37  ;;  %v600_v43 = vadd.f32 %v599_v40, %v352_v25  ;;  %v676_v44 = vpop.f32.mrb[6].mxu1  ;;  %v601_v45 = vpop.f32.mrb[7].mxu0  ;;  %v712_v37 = vld [vmem:[#allocation8 + $0x38] sm:$0xff] }
 0x1a8   :  { %v693_v46 = vmul.f32 1.442695, %v683_v38  ;;  %v691_v47 = vmul.f32 1.442695, %v682_v39  ;;  %v677_v48 = vadd.f32 %v676_v44, %v360_v26  ;;  %v602_v49 = vadd.f32 %v601_v45, %v356_v27  ;;  %v678_v50 = vpop.f32.mrb[7].mxu1 }
 0x1a9   :  { %1023 = vpow2.f32 %v689_v41  ;;  %v695_v51 = vmul.f32 1.442695, %v684_v42  ;;  %v685_v52 = vmul.f32 0.5, %v600_v43  ;;  %v679_v16 = vadd.f32 %v678_v50, %v364_v28 }
 0x1aa   :  { %1025 = vpow2.f32 %v693_v46  ;;  %v687_v53 = vmul.f32 0.5, %v677_v48  ;;  %v686_v54 = vmul.f32 0.5, %v602_v49  ;;  %v442_v27 = vadd.f32 %v1279_v11, %v340_v3 }
 0x1ab   :  { %1027 = vpow2.f32 %v691_v47  ;;  %v697_v55 = vmul.f32 1.442695, %v685_v52  ;;  %v688_v56 = vmul.f32 0.5, %v679_v16  ;;  %v523_v39 = vadd.f32 %v1285_v18, %v344_v1 }
 0x1ac   :  { %1029 = vpow2.f32 %v695_v51  ;;  %v701_v58 = vmul.f32 1.442695, %v687_v53  ;;  %v699_v59 = vmul.f32 1.442695, %v686_v54  ;;  %v448_v42 = vadd.f32 %v1287_v15, %v340_v3 }
 0x1ad   :  { %1031 = vpow2.f32 %v697_v55  ;;  %v703_v61 = vmul.f32 1.442695, %v688_v56 }
 0x1ae   :  { %1033 = vpow2.f32 %v701_v58 }
 0x1af   :  { %1035 = vpow2.f32 %v699_v59 }
 0x1b0   :  { %1037 = vpow2.f32 %v703_v61 }
 0x1b3   :  { %v1024_v5 = vpop.eup %1023 }
 0x1b4   :  { %v1026_v8 = vpop.eup %1025  ;;  %v713_v21 = vmul.f32 %v1024_v5, %v705_v2 }
 0x1b5   :  { %v1028_v22 = vpop.eup %1027  ;;  %v715_v25 = vmul.f32 %v1026_v8, %v707_v4 }
 0x1b6   :  { %v1030_v26 = vpop.eup %1029  ;;  %v721_v28 = vadd.f32 %v713_v21, %v440_v13  ;;  %v714_v29 = vmul.f32 %v1028_v22, %v706_v7 }
 0x1b7   :  { %v1032_v31 = vpop.eup %1031  ;;  %v723_v32 = vadd.f32 %v715_v25, %v517_v23  ;;  %v716_v33 = vmul.f32 %v1030_v26, %v708_v17 }
 0x1b8   :  { %v1034_v9 = vpop.eup %1033  ;;  %729 = vst [vmem:[#allocation10] sm:$0xff] %v721_v28  ;;  %v722_v36 = vadd.f32 %v714_v29, %v442_v27  ;;  %v717_v10 = vmul.f32 %v1032_v31, %v709_v20 }
 0x1b9   :  { %v1036_v38 = vpop.eup %1035  ;;  %731 = vst [vmem:[#allocation10 + $0x10] sm:$0xff] %v723_v32  ;;  %v724_v11 = vadd.f32 %v716_v33, %v519_v24  ;;  %v719_v40 = vmul.f32 %v1034_v9, %v711_v30 }
 0x1ba   :  { %v1038_v41 = vpop.eup %1037  ;;  %730 = vst [vmem:[#allocation10 + $0x8] sm:$0xff] %v722_v36  ;;  %v725_v12 = vadd.f32 %v717_v10, %v446_v35  ;;  %v718_v43 = vmul.f32 %v1036_v38, %v710_v34 }
 0x1bb   :  { %732 = vst [vmem:[#allocation10 + $0x18] sm:$0xff] %v724_v11  ;;  %v727_v44 = vadd.f32 %v719_v40, %v523_v39  ;;  %v720_v45 = vmul.f32 %v1038_v41, %v712_v37 }
 0x1bc   :  { %733 = vst [vmem:[#allocation10 + $0x20] sm:$0xff] %v725_v12  ;;  %v726_v46 = vadd.f32 %v718_v43, %v448_v42 }
 0x1bd   :  { %735 = vst [vmem:[#allocation10 + $0x30] sm:$0xff] %v727_v44  ;;  %v728_v18 = vadd.f32 %v720_v45, %v525_v14 }
 0x1be   :  { %734 = vst [vmem:[#allocation10 + $0x28] sm:$0xff] %v726_v46 }
 0x1bf   :  { %736 = vst [vmem:[#allocation10 + $0x38] sm:$0xff] %v728_v18 }
 0x1c0   :  { %1138 = shalt.err (!%p1135_p8)
}
 0x1c1   :  { %s1139_s17 = scalar_lea.hbm %s1318_s4, 1024 }
 0x1c2   :  { %p1140_p9 = scmp.ne.s32.totalorder %s1318_s4, %s1139_s17  ;;  %p1143_p10 = scmp.lt.u32.totalorder %s1139_s17, %s1318_s4 }
 0x1c4   :  { %p1145_p11 = pnand %p1143_p10, %p1140_p9 }
 0x1c6   :  { %1148 = shalt.err (!%p1145_p11)
}
 0x1c7   :  { %748 = dma.vmem_to_hbm [thread:$0]  %s743_s13, 1024, %s1318_s4, [#allocation4], %s1165_s2, %s1165_s2, %s1166_s11  }
 0x1c8   :  { %1155 = dma.done.wait [#allocation4], 1024  }
 0x1c9   :  { %1156 = vsyncadd [#allocation4], 4294966272 }
 0x1ca   :  { %752 = vsyncpa [#allocation3], 1 }
 0x1cb   :  { %753 = vsyncpa [#allocation6], 1 }
 0x1cc   :  { %754 = vsyncpa [#allocation9], 1 }
 0x1cd   :  { %755 = vsyncpa [#allocation4], 1 }

</bundles_post_ra>
